<compile_context>
chip_gen: v7x
topology: tpu7x:2x2x1
jax: 0.10.0
libtpu: 0.0.40
codegen_flags: <defaults>
</compile_context>

<pallas_src>
import functools
import math

import jax
import jax.numpy as jnp
from jax.experimental import pallas as pl
from jax.experimental.pallas import tpu as pltpu


# -----------------------------------------------------------------------------
# Pallas kernel: one batch-tile of ANALOGY scoring + partial UKGE loss
# -----------------------------------------------------------------------------
def _analogy_tile_kernel(function, p_neg, inv_batch, inv_neg, reg_scale,
                         # positives: e_h, e_r, e_t, h_re, h_im, r_re, r_im, t_re, t_im
                         ph, pr, pt, phr, phi, prr, pri, ptr, pti,
                         w_ref,
                         # head-corrupted negatives (flattened B*N rows)
                         ah, ar_, at, ahr, ahi, arr_, ari, atr, ati,
                         # tail-corrupted negatives (flattened B*N rows)
                         bh, br, bt, bhr, bhi, brr, bri, btr, bti,
                         lw_ref, lb_ref, out_ref):
    lw = lw_ref[0, 0]          # nn.Linear(1, 1).weight
    lb = lb_ref[0, 0]          # nn.Linear(1, 1).bias

    def score(e_h, e_r, e_t, hr, hi, rr, ri, tr, ti):
        dm = jnp.sum(e_r * (e_h * e_t), axis=1, keepdims=True)
        cx = jnp.sum(hr * tr * rr + hi * ti * rr + hr * ti * ri - hi * tr * ri,
                     axis=1, keepdims=True)
        return dm + cx

    def fprob(s):
        y = lw * s + lb                       # self.liner(...)
        if function == "logi":
            y = jax.nn.sigmoid(y)
        return y

    pos_vals = [ph[...], pr[...], pt[...],
                phr[...], phi[...], prr[...], pri[...], ptr[...], pti[...]]

    # positive triples: sum_b (f_prob_h - w)^2 over this tile
    f_pos = fprob(score(*pos_vals))                                   # (TB, 1)
    pos_sq = jnp.sum(jnp.square(f_pos - w_ref[...]))

    # negative triples (flattened TB*N rows each)
    f_hn = fprob(score(ah[...], ar_[...], at[...], ahr[...], ahi[...],
                       arr_[...], ari[...], atr[...], ati[...]))
    f_tn = fprob(score(bh[...], br[...], bt[...], bhr[...], bhi[...],
                       brr[...], bri[...], btr[...], bti[...]))
    # sum_b mean_n(x[b,n]^2) == sum(x^2) / N
    neg_sq = (jnp.sum(jnp.square(f_hn)) + jnp.sum(jnp.square(f_tn))) * inv_neg

    # 9-term regularizer on the positive-triple embeddings of this tile
    reg = sum(jnp.sum(jnp.square(v)) for v in pos_vals)

    this_loss = (neg_sq * 0.5 * p_neg + pos_sq) * inv_batch
    out_ref[0, 0] = this_loss + reg_scale * reg * 0.5 * inv_batch


def _pick_tile_b(batch_size, max_tile_b):
    """Largest tile that divides batch_size, is <=max_tile_b and satisfies the
    (8,128) sublane rule (multiple of 8 unless it equals the whole batch)."""
    if batch_size <= max_tile_b:
        return batch_size
    d = (min(max_tile_b, batch_size) // 8) * 8
    while d >= 8:
        if batch_size % d == 0:
            return d
        d -= 8
    return batch_size  # fallback: whole batch (may exceed the VMEM budget)


# -----------------------------------------------------------------------------
# Wrapper: embedding gathers (XLA) + one gridded pallas_call + tiny final reduce
# -----------------------------------------------------------------------------
def u_analogy_loss(params, h, r, t, w, n_hn, n_rel_hn, n_t, n_h, n_rel_tn, n_tn,
                   *, dim, batch_size, neg_per_positive, reg_scale,
                   function="logi", p_neg=1.0):
    D, D2 = dim, dim // 2
    N = neg_per_positive
    ent, ent_r, ent_i = params["ent"], params["ent_real"], params["ent_img"]
    rel, rel_r, rel_i = params["rel"], params["rel_real"], params["rel_img"]

    # TODO(synk): fuse these gathers into the kernel (scalar-prefetch indices +
    # manual row DMAs from HBM tables) to remove the gathered-array HBM round trip.
    def stream(hi_idx, ri_idx, ti_idx):
        return [ent[hi_idx], rel[ri_idx], ent[ti_idx],
                ent_r[hi_idx], ent_i[hi_idx],
                rel_r[ri_idx], rel_i[ri_idx],
                ent_r[ti_idx], ent_i[ti_idx]]

    pos_arrays = stream(h, r, t)                                         # (B, D|D2)
    hn_arrays = stream(n_hn.reshape(-1), n_rel_hn.reshape(-1), n_t.reshape(-1))
    tn_arrays = stream(n_h.reshape(-1), n_rel_tn.reshape(-1), n_tn.reshape(-1))
    w2 = w.astype(jnp.float32).reshape(batch_size, 1)                    # (B, 1)
    lw = params["liner_w"].reshape(1, 1).astype(jnp.float32)
    lb = params["liner_b"].reshape(1, 1).astype(jnp.float32)

    # ---- tile selection: keep per-step live inputs <= ~10 MiB so that double-
    # buffered streams fit comfortably in 64 MiB (v7x) and 128 MiB (v5e/v6e) VMEM.
    bytes_per_batch_row = 4 * (6 * D) * (1 + 2 * N) + 4                  # f32
    vmem_budget = 10 * 1024 * 1024
    tile_b = _pick_tile_b(batch_size, max(1, vmem_budget // bytes_per_batch_row))
    grid = batch_size // tile_b
    tile_bytes = tile_b * bytes_per_batch_row
    vmem_limit = int(min(100 * 1024 * 1024, max(32 * 1024 * 1024, 3 * tile_bytes)))

    widths = [D, D, D, D2, D2, D2, D2, D2, D2]
    pos_specs = [pl.BlockSpec((tile_b, wd), lambda i: (i, 0)) for wd in widths]
    w_spec = pl.BlockSpec((tile_b, 1), lambda i: (i, 0))
    neg_specs = [pl.BlockSpec((tile_b * N, wd), lambda i: (i, 0)) for wd in widths]
    smem = pltpu.MemorySpace.SMEM
    scalar_spec = pl.BlockSpec((1, 1), lambda i: (0, 0), memory_space=smem)

    kernel = functools.partial(
        _analogy_tile_kernel, function, float(p_neg),
        1.0 / float(batch_size), 1.0 / float(N), float(reg_scale))

    rows_total = batch_size * (1 + 2 * N)
    cost = pl.CostEstimate(
        flops=int(rows_total * 12 * D + batch_size * 6 * D),
        transcendentals=int(rows_total if function == "logi" else 0),
        bytes_accessed=int(4 * rows_total * 6 * D + 4 * batch_size + 4 * grid))

    partials = pl.pallas_call(
        kernel,
        grid=(grid,),
        out_shape=jax.ShapeDtypeStruct((grid, 1), jnp.float32),
        in_specs=(pos_specs + [w_spec] + neg_specs + neg_specs
                  + [scalar_spec, scalar_spec]),
        out_specs=pl.BlockSpec((1, 1), lambda i: (i, 0), memory_space=smem),
        compiler_params=pltpu.CompilerParams(
            dimension_semantics=("parallel",),
            vmem_limit_bytes=vmem_limit),
        cost_estimate=cost,
    )(*pos_arrays, w2, *hn_arrays, *tn_arrays, lw, lb)

    # linear combine across tiles -> exact final loss
    return jnp.sum(partials)


# -----------------------------------------------------------------------------
# Pure-JAX reference (mirrors the PyTorch forward) for a correctness check
# -----------------------------------------------------------------------------
def reference_loss(params, h, r, t, w, n_hn, n_rel_hn, n_t, n_h, n_rel_tn, n_tn,
                   *, batch_size, reg_scale, function="logi", p_neg=1.0):
    ent, ent_r, ent_i = params["ent"], params["ent_real"], params["ent_img"]
    rel, rel_r, rel_i = params["rel"], params["rel_real"], params["rel_img"]
    lw = params["liner_w"].reshape(()).astype(jnp.float32)
    lb = params["liner_b"].reshape(()).astype(jnp.float32)

    def liner(x):
        y = lw * x + lb
        return jax.nn.sigmoid(y) if function == "logi" else y

    h_e, r_e, t_e = ent[h], rel[r], ent[t]
    hr, hi, rr, ri, tr, ti = ent_r[h], ent_i[h], rel_r[r], rel_i[r], ent_r[t], ent_i[t]
    htr = jnp.sum(r_e * (h_e * t_e), axis=1)
    htr_c = jnp.sum(hr * tr * rr + hi * ti * rr + hr * ti * ri - hi * tr * ri, axis=1)
    f_prob_h = liner(htr + htr_c)
    f_score_h = jnp.square(f_prob_h - w)

    def neg_score(hh, rrr, tt):
        he, re_, te = ent[hh], rel[rrr], ent[tt]
        hre, hie = ent_r[hh], ent_i[hh]
        rre, rie = rel_r[rrr], rel_i[rrr]
        tre, tie = ent_r[tt], ent_i[tt]
        cx = jnp.sum(hre * tre * rre + hie * tie * rre + hre * tie * rie
                     - hie * tre * rie, axis=2)
        dm = jnp.sum(re_ * (he * te), axis=2)
        return liner(cx + dm)

    f_prob_hn = neg_score(n_hn, n_rel_hn, n_t)
    f_prob_tn = neg_score(n_h, n_rel_tn, n_tn)
    f_score_hn = jnp.mean(jnp.square(f_prob_hn), axis=1)
    f_score_tn = jnp.mean(jnp.square(f_prob_tn), axis=1)

    this_loss = jnp.sum((f_score_tn + f_score_hn) / 2.0 * p_neg + f_score_h) / batch_size
    reg = sum(jnp.sum(jnp.square(x)) for x in
              (h_e, r_e, t_e, hr, hi, rr, ri, tr, ti)) / 2.0 / batch_size
    return this_loss + reg_scale * reg


# -----------------------------------------------------------------------------
# Deterministic parameter init (mirrors __init__ shapes)
# -----------------------------------------------------------------------------
def init_params(key, num_cons, num_rels, dim):
    def xavier_uniform(k, shape):
        fan_out, fan_in = shape
        a = math.sqrt(6.0 / (fan_in + fan_out))
        return jax.random.uniform(k, shape, jnp.float32, -a, a)

    ks = jax.random.split(key, 8)
    return {
        "ent":      xavier_uniform(ks[0], (num_cons, dim)),
        "rel":      xavier_uniform(ks[1], (num_rels, dim)),
        "ent_real": xavier_uniform(ks[2], (num_cons, dim // 2)),
        "ent_img":  xavier_uniform(ks[3], (num_cons, dim // 2)),
        "rel_real": xavier_uniform(ks[4], (num_rels, dim // 2)),
        "rel_img":  xavier_uniform(ks[5], (num_rels, dim // 2)),
        "liner_w":  0.3 * jax.random.normal(ks[6], (1, 1), jnp.float32),
        "liner_b":  0.3 * jax.random.normal(ks[7], (1,), jnp.float32),
    }


if __name__ == "__main__":
    # small shapes consistent with the module
    NUM_CONS, NUM_RELS, DIM = 32, 8, 32
    BATCH, NEG = 8, 4
    REG_SCALE = 5e-4
    FUNCTION = "logi"   # param.function is undefined upstream; logistic (UKGE default)

    key = jax.random.PRNGKey(0)
    kp, kh, kr, kt, kw, k1, k2, k3, k4, k5, k6 = jax.random.split(key, 11)
    params = init_params(kp, NUM_CONS, NUM_RELS, DIM)

    h = jax.random.randint(kh, (BATCH,), 0, NUM_CONS, jnp.int32)
    r = jax.random.randint(kr, (BATCH,), 0, NUM_RELS, jnp.int32)
    t = jax.random.randint(kt, (BATCH,), 0, NUM_CONS, jnp.int32)
    w = jax.random.uniform(kw, (BATCH,), jnp.float32)
    n_hn = jax.random.randint(k1, (BATCH, NEG), 0, NUM_CONS, jnp.int32)
    n_rel_hn = jax.random.randint(k2, (BATCH, NEG), 0, NUM_RELS, jnp.int32)
    n_t = jax.random.randint(k3, (BATCH, NEG), 0, NUM_CONS, jnp.int32)
    n_h = jax.random.randint(k4, (BATCH, NEG), 0, NUM_CONS, jnp.int32)
    n_rel_tn = jax.random.randint(k5, (BATCH, NEG), 0, NUM_RELS, jnp.int32)
    n_tn = jax.random.randint(k6, (BATCH, NEG), 0, NUM_CONS, jnp.int32)

    loss = u_analogy_loss(
        params, h, r, t, w, n_hn, n_rel_hn, n_t, n_h, n_rel_tn, n_tn,
        dim=DIM, batch_size=BATCH, neg_per_positive=NEG,
        reg_scale=REG_SCALE, function=FUNCTION, p_neg=1.0)
    loss = jax.block_until_ready(loss)

    ref = reference_loss(
        params, h, r, t, w, n_hn, n_rel_hn, n_t, n_h, n_rel_tn, n_tn,
        batch_size=BATCH, reg_scale=REG_SCALE, function=FUNCTION, p_neg=1.0)
    ref = jax.block_until_ready(ref)

    assert jnp.allclose(loss, ref, rtol=1e-4, atol=1e-5), (loss, ref)
    print("KERNEL_OK")
</pallas_src>

<mosaic_0001>
module attributes {stable_mosaic.version = 11 : i64} {
  func.func @_analogy_tile_kernel(%arg0: i32, %arg1: memref<8x32xf32, #tpu.memory_space<vmem>>, %arg2: memref<8x32xf32, #tpu.memory_space<vmem>>, %arg3: memref<8x32xf32, #tpu.memory_space<vmem>>, %arg4: memref<8x16xf32, #tpu.memory_space<vmem>>, %arg5: memref<8x16xf32, #tpu.memory_space<vmem>>, %arg6: memref<8x16xf32, #tpu.memory_space<vmem>>, %arg7: memref<8x16xf32, #tpu.memory_space<vmem>>, %arg8: memref<8x16xf32, #tpu.memory_space<vmem>>, %arg9: memref<8x16xf32, #tpu.memory_space<vmem>>, %arg10: memref<8x1xf32, #tpu.memory_space<vmem>>, %arg11: memref<32x32xf32, #tpu.memory_space<vmem>>, %arg12: memref<32x32xf32, #tpu.memory_space<vmem>>, %arg13: memref<32x32xf32, #tpu.memory_space<vmem>>, %arg14: memref<32x16xf32, #tpu.memory_space<vmem>>, %arg15: memref<32x16xf32, #tpu.memory_space<vmem>>, %arg16: memref<32x16xf32, #tpu.memory_space<vmem>>, %arg17: memref<32x16xf32, #tpu.memory_space<vmem>>, %arg18: memref<32x16xf32, #tpu.memory_space<vmem>>, %arg19: memref<32x16xf32, #tpu.memory_space<vmem>>, %arg20: memref<32x32xf32, #tpu.memory_space<vmem>>, %arg21: memref<32x32xf32, #tpu.memory_space<vmem>>, %arg22: memref<32x32xf32, #tpu.memory_space<vmem>>, %arg23: memref<32x16xf32, #tpu.memory_space<vmem>>, %arg24: memref<32x16xf32, #tpu.memory_space<vmem>>, %arg25: memref<32x16xf32, #tpu.memory_space<vmem>>, %arg26: memref<32x16xf32, #tpu.memory_space<vmem>>, %arg27: memref<32x16xf32, #tpu.memory_space<vmem>>, %arg28: memref<32x16xf32, #tpu.memory_space<vmem>>, %arg29: memref<1x1xf32, #tpu.memory_space<smem>>, %arg30: memref<1x1xf32, #tpu.memory_space<smem>>, %arg31: memref<1x1xf32, #tpu.memory_space<smem>>) attributes {dimension_semantics = [#tpu.dimension_semantics<parallel>], iteration_bounds = array<i64: 1>, scalar_prefetch = 0 : i64, scratch_operands = 0 : i64, tpu.core_type = #tpu.core_type<tc>, window_params = [{transform_indices = @transform_0, window_bounds = array<i64: 8, 32>}, {transform_indices = @transform_1, window_bounds = array<i64: 8, 32>}, {transform_indices = @transform_2, window_bounds = array<i64: 8, 32>}, {transform_indices = @transform_3, window_bounds = array<i64: 8, 16>}, {transform_indices = @transform_4, window_bounds = array<i64: 8, 16>}, {transform_indices = @transform_5, window_bounds = array<i64: 8, 16>}, {transform_indices = @transform_6, window_bounds = array<i64: 8, 16>}, {transform_indices = @transform_7, window_bounds = array<i64: 8, 16>}, {transform_indices = @transform_8, window_bounds = array<i64: 8, 16>}, {transform_indices = @transform_9, window_bounds = array<i64: 8, 1>}, {transform_indices = @transform_10, window_bounds = array<i64: 32, 32>}, {transform_indices = @transform_11, window_bounds = array<i64: 32, 32>}, {transform_indices = @transform_12, window_bounds = array<i64: 32, 32>}, {transform_indices = @transform_13, window_bounds = array<i64: 32, 16>}, {transform_indices = @transform_14, window_bounds = array<i64: 32, 16>}, {transform_indices = @transform_15, window_bounds = array<i64: 32, 16>}, {transform_indices = @transform_16, window_bounds = array<i64: 32, 16>}, {transform_indices = @transform_17, window_bounds = array<i64: 32, 16>}, {transform_indices = @transform_18, window_bounds = array<i64: 32, 16>}, {transform_indices = @transform_19, window_bounds = array<i64: 32, 32>}, {transform_indices = @transform_20, window_bounds = array<i64: 32, 32>}, {transform_indices = @transform_21, window_bounds = array<i64: 32, 32>}, {transform_indices = @transform_22, window_bounds = array<i64: 32, 16>}, {transform_indices = @transform_23, window_bounds = array<i64: 32, 16>}, {transform_indices = @transform_24, window_bounds = array<i64: 32, 16>}, {transform_indices = @transform_25, window_bounds = array<i64: 32, 16>}, {transform_indices = @transform_26, window_bounds = array<i64: 32, 16>}, {transform_indices = @transform_27, window_bounds = array<i64: 32, 16>}, {transform_indices = @transform_28, window_bounds = array<i64: 1, 1>}, {transform_indices = @transform_29, window_bounds = array<i64: 1, 1>}, {transform_indices = @transform_30, window_bounds = array<i64: 1, 1>}]} {
    %c0 = arith.constant 0 : index
    %c0_0 = arith.constant 0 : index
    %0 = memref.load %arg29[%c0, %c0_0] : memref<1x1xf32, #tpu.memory_space<smem>>
    %c0_1 = arith.constant 0 : index
    %c0_2 = arith.constant 0 : index
    %1 = memref.load %arg30[%c0_1, %c0_2] : memref<1x1xf32, #tpu.memory_space<smem>>
    %c0_3 = arith.constant 0 : index
    %c0_4 = arith.constant 0 : index
    %2 = vector.load %arg1[%c0_3, %c0_4] : memref<8x32xf32, #tpu.memory_space<vmem>>, vector<8x32xf32>
    %c0_5 = arith.constant 0 : index
    %c0_6 = arith.constant 0 : index
    %3 = vector.load %arg2[%c0_5, %c0_6] : memref<8x32xf32, #tpu.memory_space<vmem>>, vector<8x32xf32>
    %c0_7 = arith.constant 0 : index
    %c0_8 = arith.constant 0 : index
    %4 = vector.load %arg3[%c0_7, %c0_8] : memref<8x32xf32, #tpu.memory_space<vmem>>, vector<8x32xf32>
    %c0_9 = arith.constant 0 : index
    %c0_10 = arith.constant 0 : index
    %5 = vector.load %arg4[%c0_9, %c0_10] : memref<8x16xf32, #tpu.memory_space<vmem>>, vector<8x16xf32>
    %c0_11 = arith.constant 0 : index
    %c0_12 = arith.constant 0 : index
    %6 = vector.load %arg5[%c0_11, %c0_12] : memref<8x16xf32, #tpu.memory_space<vmem>>, vector<8x16xf32>
    %c0_13 = arith.constant 0 : index
    %c0_14 = arith.constant 0 : index
    %7 = vector.load %arg6[%c0_13, %c0_14] : memref<8x16xf32, #tpu.memory_space<vmem>>, vector<8x16xf32>
    %c0_15 = arith.constant 0 : index
    %c0_16 = arith.constant 0 : index
    %8 = vector.load %arg7[%c0_15, %c0_16] : memref<8x16xf32, #tpu.memory_space<vmem>>, vector<8x16xf32>
    %c0_17 = arith.constant 0 : index
    %c0_18 = arith.constant 0 : index
    %9 = vector.load %arg8[%c0_17, %c0_18] : memref<8x16xf32, #tpu.memory_space<vmem>>, vector<8x16xf32>
    %c0_19 = arith.constant 0 : index
    %c0_20 = arith.constant 0 : index
    %10 = vector.load %arg9[%c0_19, %c0_20] : memref<8x16xf32, #tpu.memory_space<vmem>>, vector<8x16xf32>
    %11 = arith.mulf %2, %4 : vector<8x32xf32>
    %12 = arith.mulf %3, %11 : vector<8x32xf32>
    %cst = arith.constant dense<0.000000e+00> : vector<8xf32>
    %13 = vector.multi_reduction <add>, %12, %cst [1] : vector<8x32xf32> to vector<8xf32>
    %14 = vector.shape_cast %13 : vector<8xf32> to vector<8x1xf32>
    %15 = arith.mulf %5, %9 : vector<8x16xf32>
    %16 = arith.mulf %15, %7 : vector<8x16xf32>
    %17 = arith.mulf %6, %10 : vector<8x16xf32>
    %18 = arith.mulf %17, %7 : vector<8x16xf32>
    %19 = arith.addf %16, %18 : vector<8x16xf32>
    %20 = arith.mulf %5, %10 : vector<8x16xf32>
    %21 = arith.mulf %20, %8 : vector<8x16xf32>
    %22 = arith.addf %19, %21 : vector<8x16xf32>
    %23 = arith.mulf %6, %9 : vector<8x16xf32>
    %24 = arith.mulf %23, %8 : vector<8x16xf32>
    %25 = arith.subf %22, %24 : vector<8x16xf32>
    %cst_21 = arith.constant dense<0.000000e+00> : vector<8xf32>
    %26 = vector.multi_reduction <add>, %25, %cst_21 [1] : vector<8x16xf32> to vector<8xf32>
    %27 = vector.shape_cast %26 : vector<8xf32> to vector<8x1xf32>
    %28 = arith.addf %14, %27 : vector<8x1xf32>
    %29 = vector.broadcast %0 : f32 to vector<8x1xf32>
    %30 = arith.mulf %29, %28 : vector<8x1xf32>
    %31 = vector.broadcast %1 : f32 to vector<8x1xf32>
    %32 = arith.addf %30, %31 : vector<8x1xf32>
    %33 = arith.negf %32 : vector<8x1xf32>
    %34 = math.exp %33 : vector<8x1xf32>
    %cst_22 = arith.constant 1.000000e+00 : f32
    %35 = vector.broadcast %cst_22 : f32 to vector<8x1xf32>
    %36 = arith.addf %35, %34 : vector<8x1xf32>
    %37 = arith.divf %35, %36 : vector<8x1xf32>
    %c0_23 = arith.constant 0 : index
    %c0_24 = arith.constant 0 : index
    %38 = vector.load %arg10[%c0_23, %c0_24] : memref<8x1xf32, #tpu.memory_space<vmem>>, vector<8x1xf32>
    %39 = arith.subf %37, %38 : vector<8x1xf32>
    %40 = arith.mulf %39, %39 : vector<8x1xf32>
    %41 = vector.shape_cast %40 : vector<8x1xf32> to vector<1x8x1xf32>
    %cst_25 = arith.constant dense<0.000000e+00> : vector<1xf32>
    %42 = vector.multi_reduction <add>, %41, %cst_25 [1, 2] : vector<1x8x1xf32> to vector<1xf32>
    %43 = vector.shape_cast %42 : vector<1xf32> to vector<1x1x1xf32>
    %44 = vector.extract %43[0, 0, 0] : f32 from vector<1x1x1xf32>
    %c0_26 = arith.constant 0 : index
    %c0_27 = arith.constant 0 : index
    %45 = vector.load %arg11[%c0_26, %c0_27] : memref<32x32xf32, #tpu.memory_space<vmem>>, vector<32x32xf32>
    %c0_28 = arith.constant 0 : index
    %c0_29 = arith.constant 0 : index
    %46 = vector.load %arg12[%c0_28, %c0_29] : memref<32x32xf32, #tpu.memory_space<vmem>>, vector<32x32xf32>
    %c0_30 = arith.constant 0 : index
    %c0_31 = arith.constant 0 : index
    %47 = vector.load %arg13[%c0_30, %c0_31] : memref<32x32xf32, #tpu.memory_space<vmem>>, vector<32x32xf32>
    %c0_32 = arith.constant 0 : index
    %c0_33 = arith.constant 0 : index
    %48 = vector.load %arg14[%c0_32, %c0_33] : memref<32x16xf32, #tpu.memory_space<vmem>>, vector<32x16xf32>
    %c0_34 = arith.constant 0 : index
    %c0_35 = arith.constant 0 : index
    %49 = vector.load %arg15[%c0_34, %c0_35] : memref<32x16xf32, #tpu.memory_space<vmem>>, vector<32x16xf32>
    %c0_36 = arith.constant 0 : index
    %c0_37 = arith.constant 0 : index
    %50 = vector.load %arg16[%c0_36, %c0_37] : memref<32x16xf32, #tpu.memory_space<vmem>>, vector<32x16xf32>
    %c0_38 = arith.constant 0 : index
    %c0_39 = arith.constant 0 : index
    %51 = vector.load %arg17[%c0_38, %c0_39] : memref<32x16xf32, #tpu.memory_space<vmem>>, vector<32x16xf32>
    %c0_40 = arith.constant 0 : index
    %c0_41 = arith.constant 0 : index
    %52 = vector.load %arg18[%c0_40, %c0_41] : memref<32x16xf32, #tpu.memory_space<vmem>>, vector<32x16xf32>
    %c0_42 = arith.constant 0 : index
    %c0_43 = arith.constant 0 : index
    %53 = vector.load %arg19[%c0_42, %c0_43] : memref<32x16xf32, #tpu.memory_space<vmem>>, vector<32x16xf32>
    %54 = arith.mulf %45, %47 : vector<32x32xf32>
    %55 = arith.mulf %46, %54 : vector<32x32xf32>
    %cst_44 = arith.constant dense<0.000000e+00> : vector<32xf32>
    %56 = vector.multi_reduction <add>, %55, %cst_44 [1] : vector<32x32xf32> to vector<32xf32>
    %57 = vector.shape_cast %56 : vector<32xf32> to vector<32x1xf32>
    %58 = arith.mulf %48, %52 : vector<32x16xf32>
    %59 = arith.mulf %58, %50 : vector<32x16xf32>
    %60 = arith.mulf %49, %53 : vector<32x16xf32>
    %61 = arith.mulf %60, %50 : vector<32x16xf32>
    %62 = arith.addf %59, %61 : vector<32x16xf32>
    %63 = arith.mulf %48, %53 : vector<32x16xf32>
    %64 = arith.mulf %63, %51 : vector<32x16xf32>
    %65 = arith.addf %62, %64 : vector<32x16xf32>
    %66 = arith.mulf %49, %52 : vector<32x16xf32>
    %67 = arith.mulf %66, %51 : vector<32x16xf32>
    %68 = arith.subf %65, %67 : vector<32x16xf32>
    %cst_45 = arith.constant dense<0.000000e+00> : vector<32xf32>
    %69 = vector.multi_reduction <add>, %68, %cst_45 [1] : vector<32x16xf32> to vector<32xf32>
    %70 = vector.shape_cast %69 : vector<32xf32> to vector<32x1xf32>
    %71 = arith.addf %57, %70 : vector<32x1xf32>
    %72 = vector.broadcast %0 : f32 to vector<32x1xf32>
    %73 = arith.mulf %72, %71 : vector<32x1xf32>
    %74 = vector.broadcast %1 : f32 to vector<32x1xf32>
    %75 = arith.addf %73, %74 : vector<32x1xf32>
    %76 = arith.negf %75 : vector<32x1xf32>
    %77 = math.exp %76 : vector<32x1xf32>
    %cst_46 = arith.constant 1.000000e+00 : f32
    %78 = vector.broadcast %cst_46 : f32 to vector<32x1xf32>
    %79 = arith.addf %78, %77 : vector<32x1xf32>
    %80 = arith.divf %78, %79 : vector<32x1xf32>
    %c0_47 = arith.constant 0 : index
    %c0_48 = arith.constant 0 : index
    %81 = vector.load %arg20[%c0_47, %c0_48] : memref<32x32xf32, #tpu.memory_space<vmem>>, vector<32x32xf32>
    %c0_49 = arith.constant 0 : index
    %c0_50 = arith.constant 0 : index
    %82 = vector.load %arg21[%c0_49, %c0_50] : memref<32x32xf32, #tpu.memory_space<vmem>>, vector<32x32xf32>
    %c0_51 = arith.constant 0 : index
    %c0_52 = arith.constant 0 : index
    %83 = vector.load %arg22[%c0_51, %c0_52] : memref<32x32xf32, #tpu.memory_space<vmem>>, vector<32x32xf32>
    %c0_53 = arith.constant 0 : index
    %c0_54 = arith.constant 0 : index
    %84 = vector.load %arg23[%c0_53, %c0_54] : memref<32x16xf32, #tpu.memory_space<vmem>>, vector<32x16xf32>
    %c0_55 = arith.constant 0 : index
    %c0_56 = arith.constant 0 : index
    %85 = vector.load %arg24[%c0_55, %c0_56] : memref<32x16xf32, #tpu.memory_space<vmem>>, vector<32x16xf32>
    %c0_57 = arith.constant 0 : index
    %c0_58 = arith.constant 0 : index
    %86 = vector.load %arg25[%c0_57, %c0_58] : memref<32x16xf32, #tpu.memory_space<vmem>>, vector<32x16xf32>
    %c0_59 = arith.constant 0 : index
    %c0_60 = arith.constant 0 : index
    %87 = vector.load %arg26[%c0_59, %c0_60] : memref<32x16xf32, #tpu.memory_space<vmem>>, vector<32x16xf32>
    %c0_61 = arith.constant 0 : index
    %c0_62 = arith.constant 0 : index
    %88 = vector.load %arg27[%c0_61, %c0_62] : memref<32x16xf32, #tpu.memory_space<vmem>>, vector<32x16xf32>
    %c0_63 = arith.constant 0 : index
    %c0_64 = arith.constant 0 : index
    %89 = vector.load %arg28[%c0_63, %c0_64] : memref<32x16xf32, #tpu.memory_space<vmem>>, vector<32x16xf32>
    %90 = arith.mulf %81, %83 : vector<32x32xf32>
    %91 = arith.mulf %82, %90 : vector<32x32xf32>
    %cst_65 = arith.constant dense<0.000000e+00> : vector<32xf32>
    %92 = vector.multi_reduction <add>, %91, %cst_65 [1] : vector<32x32xf32> to vector<32xf32>
    %93 = vector.shape_cast %92 : vector<32xf32> to vector<32x1xf32>
    %94 = arith.mulf %84, %88 : vector<32x16xf32>
    %95 = arith.mulf %94, %86 : vector<32x16xf32>
    %96 = arith.mulf %85, %89 : vector<32x16xf32>
    %97 = arith.mulf %96, %86 : vector<32x16xf32>
    %98 = arith.addf %95, %97 : vector<32x16xf32>
    %99 = arith.mulf %84, %89 : vector<32x16xf32>
    %100 = arith.mulf %99, %87 : vector<32x16xf32>
    %101 = arith.addf %98, %100 : vector<32x16xf32>
    %102 = arith.mulf %85, %88 : vector<32x16xf32>
    %103 = arith.mulf %102, %87 : vector<32x16xf32>
    %104 = arith.subf %101, %103 : vector<32x16xf32>
    %cst_66 = arith.constant dense<0.000000e+00> : vector<32xf32>
    %105 = vector.multi_reduction <add>, %104, %cst_66 [1] : vector<32x16xf32> to vector<32xf32>
    %106 = vector.shape_cast %105 : vector<32xf32> to vector<32x1xf32>
    %107 = arith.addf %93, %106 : vector<32x1xf32>
    %108 = vector.broadcast %0 : f32 to vector<32x1xf32>
    %109 = arith.mulf %108, %107 : vector<32x1xf32>
    %110 = vector.broadcast %1 : f32 to vector<32x1xf32>
    %111 = arith.addf %109, %110 : vector<32x1xf32>
    %112 = arith.negf %111 : vector<32x1xf32>
    %113 = math.exp %112 : vector<32x1xf32>
    %cst_67 = arith.constant 1.000000e+00 : f32
    %114 = vector.broadcast %cst_67 : f32 to vector<32x1xf32>
    %115 = arith.addf %114, %113 : vector<32x1xf32>
    %116 = arith.divf %114, %115 : vector<32x1xf32>
    %117 = arith.mulf %80, %80 : vector<32x1xf32>
    %118 = vector.shape_cast %117 : vector<32x1xf32> to vector<1x32x1xf32>
    %cst_68 = arith.constant dense<0.000000e+00> : vector<1xf32>
    %119 = vector.multi_reduction <add>, %118, %cst_68 [1, 2] : vector<1x32x1xf32> to vector<1xf32>
    %120 = vector.shape_cast %119 : vector<1xf32> to vector<1x1x1xf32>
    %121 = vector.extract %120[0, 0, 0] : f32 from vector<1x1x1xf32>
    %122 = arith.mulf %116, %116 : vector<32x1xf32>
    %123 = vector.shape_cast %122 : vector<32x1xf32> to vector<1x32x1xf32>
    %cst_69 = arith.constant dense<0.000000e+00> : vector<1xf32>
    %124 = vector.multi_reduction <add>, %123, %cst_69 [1, 2] : vector<1x32x1xf32> to vector<1xf32>
    %125 = vector.shape_cast %124 : vector<1xf32> to vector<1x1x1xf32>
    %126 = vector.extract %125[0, 0, 0] : f32 from vector<1x1x1xf32>
    %127 = arith.addf %121, %126 : f32
    %cst_70 = arith.constant 2.500000e-01 : f32
    %128 = arith.mulf %127, %cst_70 : f32
    %129 = arith.mulf %2, %2 : vector<8x32xf32>
    %130 = vector.shape_cast %129 : vector<8x32xf32> to vector<1x8x32xf32>
    %cst_71 = arith.constant dense<0.000000e+00> : vector<1xf32>
    %131 = vector.multi_reduction <add>, %130, %cst_71 [1, 2] : vector<1x8x32xf32> to vector<1xf32>
    %132 = vector.shape_cast %131 : vector<1xf32> to vector<1x1x1xf32>
    %133 = vector.extract %132[0, 0, 0] : f32 from vector<1x1x1xf32>
    %cst_72 = arith.constant 0.000000e+00 : f32
    %134 = arith.addf %cst_72, %133 : f32
    %135 = arith.mulf %3, %3 : vector<8x32xf32>
    %136 = vector.shape_cast %135 : vector<8x32xf32> to vector<1x8x32xf32>
    %cst_73 = arith.constant dense<0.000000e+00> : vector<1xf32>
    %137 = vector.multi_reduction <add>, %136, %cst_73 [1, 2] : vector<1x8x32xf32> to vector<1xf32>
    %138 = vector.shape_cast %137 : vector<1xf32> to vector<1x1x1xf32>
    %139 = vector.extract %138[0, 0, 0] : f32 from vector<1x1x1xf32>
    %140 = arith.addf %134, %139 : f32
    %141 = arith.mulf %4, %4 : vector<8x32xf32>
    %142 = vector.shape_cast %141 : vector<8x32xf32> to vector<1x8x32xf32>
    %cst_74 = arith.constant dense<0.000000e+00> : vector<1xf32>
    %143 = vector.multi_reduction <add>, %142, %cst_74 [1, 2] : vector<1x8x32xf32> to vector<1xf32>
    %144 = vector.shape_cast %143 : vector<1xf32> to vector<1x1x1xf32>
    %145 = vector.extract %144[0, 0, 0] : f32 from vector<1x1x1xf32>
    %146 = arith.addf %140, %145 : f32
    %147 = arith.mulf %5, %5 : vector<8x16xf32>
    %148 = vector.shape_cast %147 : vector<8x16xf32> to vector<1x8x16xf32>
    %cst_75 = arith.constant dense<0.000000e+00> : vector<1xf32>
    %149 = vector.multi_reduction <add>, %148, %cst_75 [1, 2] : vector<1x8x16xf32> to vector<1xf32>
    %150 = vector.shape_cast %149 : vector<1xf32> to vector<1x1x1xf32>
    %151 = vector.extract %150[0, 0, 0] : f32 from vector<1x1x1xf32>
    %152 = arith.addf %146, %151 : f32
    %153 = arith.mulf %6, %6 : vector<8x16xf32>
    %154 = vector.shape_cast %153 : vector<8x16xf32> to vector<1x8x16xf32>
    %cst_76 = arith.constant dense<0.000000e+00> : vector<1xf32>
    %155 = vector.multi_reduction <add>, %154, %cst_76 [1, 2] : vector<1x8x16xf32> to vector<1xf32>
    %156 = vector.shape_cast %155 : vector<1xf32> to vector<1x1x1xf32>
    %157 = vector.extract %156[0, 0, 0] : f32 from vector<1x1x1xf32>
    %158 = arith.addf %152, %157 : f32
    %159 = arith.mulf %7, %7 : vector<8x16xf32>
    %160 = vector.shape_cast %159 : vector<8x16xf32> to vector<1x8x16xf32>
    %cst_77 = arith.constant dense<0.000000e+00> : vector<1xf32>
    %161 = vector.multi_reduction <add>, %160, %cst_77 [1, 2] : vector<1x8x16xf32> to vector<1xf32>
    %162 = vector.shape_cast %161 : vector<1xf32> to vector<1x1x1xf32>
    %163 = vector.extract %162[0, 0, 0] : f32 from vector<1x1x1xf32>
    %164 = arith.addf %158, %163 : f32
    %165 = arith.mulf %8, %8 : vector<8x16xf32>
    %166 = vector.shape_cast %165 : vector<8x16xf32> to vector<1x8x16xf32>
    %cst_78 = arith.constant dense<0.000000e+00> : vector<1xf32>
    %167 = vector.multi_reduction <add>, %166, %cst_78 [1, 2] : vector<1x8x16xf32> to vector<1xf32>
    %168 = vector.shape_cast %167 : vector<1xf32> to vector<1x1x1xf32>
    %169 = vector.extract %168[0, 0, 0] : f32 from vector<1x1x1xf32>
    %170 = arith.addf %164, %169 : f32
    %171 = arith.mulf %9, %9 : vector<8x16xf32>
    %172 = vector.shape_cast %171 : vector<8x16xf32> to vector<1x8x16xf32>
    %cst_79 = arith.constant dense<0.000000e+00> : vector<1xf32>
    %173 = vector.multi_reduction <add>, %172, %cst_79 [1, 2] : vector<1x8x16xf32> to vector<1xf32>
    %174 = vector.shape_cast %173 : vector<1xf32> to vector<1x1x1xf32>
    %175 = vector.extract %174[0, 0, 0] : f32 from vector<1x1x1xf32>
    %176 = arith.addf %170, %175 : f32
    %177 = arith.mulf %10, %10 : vector<8x16xf32>
    %178 = vector.shape_cast %177 : vector<8x16xf32> to vector<1x8x16xf32>
    %cst_80 = arith.constant dense<0.000000e+00> : vector<1xf32>
    %179 = vector.multi_reduction <add>, %178, %cst_80 [1, 2] : vector<1x8x16xf32> to vector<1xf32>
    %180 = vector.shape_cast %179 : vector<1xf32> to vector<1x1x1xf32>
    %181 = vector.extract %180[0, 0, 0] : f32 from vector<1x1x1xf32>
    %182 = arith.addf %176, %181 : f32
    %cst_81 = arith.constant 5.000000e-01 : f32
    %183 = arith.mulf %128, %cst_81 : f32
    %cst_82 = arith.constant 1.000000e+00 : f32
    %184 = arith.mulf %183, %cst_82 : f32
    %185 = arith.addf %184, %44 : f32
    %cst_83 = arith.constant 1.250000e-01 : f32
    %186 = arith.mulf %185, %cst_83 : f32
    %cst_84 = arith.constant 5.000000e-04 : f32
    %187 = arith.mulf %cst_84, %182 : f32
    %cst_85 = arith.constant 5.000000e-01 : f32
    %188 = arith.mulf %187, %cst_85 : f32
    %cst_86 = arith.constant 1.250000e-01 : f32
    %189 = arith.mulf %188, %cst_86 : f32
    %190 = arith.addf %186, %189 : f32
    %c0_87 = arith.constant 0 : index
    %c0_88 = arith.constant 0 : index
    %191 = memref.load %arg31[%c0_87, %c0_88] : memref<1x1xf32, #tpu.memory_space<smem>>
    memref.store %190, %arg31[%c0_87, %c0_88] : memref<1x1xf32, #tpu.memory_space<smem>>
    return
  }
  func.func @transform_0(%arg0: i32) -> (i32, i32) {
    %c0_i32 = arith.constant 0 : i32
    %c0_i32_0 = arith.constant 0 : i32
    return %arg0, %c0_i32 : i32, i32
  }
  func.func @transform_1(%arg0: i32) -> (i32, i32) {
    %c0_i32 = arith.constant 0 : i32
    %c0_i32_0 = arith.constant 0 : i32
    return %arg0, %c0_i32 : i32, i32
  }
  func.func @transform_2(%arg0: i32) -> (i32, i32) {
    %c0_i32 = arith.constant 0 : i32
    %c0_i32_0 = arith.constant 0 : i32
    return %arg0, %c0_i32 : i32, i32
  }
  func.func @transform_3(%arg0: i32) -> (i32, i32) {
    %c0_i32 = arith.constant 0 : i32
    %c0_i32_0 = arith.constant 0 : i32
    return %arg0, %c0_i32 : i32, i32
  }
  func.func @transform_4(%arg0: i32) -> (i32, i32) {
    %c0_i32 = arith.constant 0 : i32
    %c0_i32_0 = arith.constant 0 : i32
    return %arg0, %c0_i32 : i32, i32
  }
  func.func @transform_5(%arg0: i32) -> (i32, i32) {
    %c0_i32 = arith.constant 0 : i32
    %c0_i32_0 = arith.constant 0 : i32
    return %arg0, %c0_i32 : i32, i32
  }
  func.func @transform_6(%arg0: i32) -> (i32, i32) {
    %c0_i32 = arith.constant 0 : i32
    %c0_i32_0 = arith.constant 0 : i32
    return %arg0, %c0_i32 : i32, i32
  }
  func.func @transform_7(%arg0: i32) -> (i32, i32) {
    %c0_i32 = arith.constant 0 : i32
    %c0_i32_0 = arith.constant 0 : i32
    return %arg0, %c0_i32 : i32, i32
  }
  func.func @transform_8(%arg0: i32) -> (i32, i32) {
    %c0_i32 = arith.constant 0 : i32
    %c0_i32_0 = arith.constant 0 : i32
    return %arg0, %c0_i32 : i32, i32
  }
  func.func @transform_9(%arg0: i32) -> (i32, i32) {
    %c0_i32 = arith.constant 0 : i32
    %c0_i32_0 = arith.constant 0 : i32
    return %arg0, %c0_i32 : i32, i32
  }
  func.func @transform_10(%arg0: i32) -> (i32, i32) {
    %c0_i32 = arith.constant 0 : i32
    %c0_i32_0 = arith.constant 0 : i32
    return %arg0, %c0_i32 : i32, i32
  }
  func.func @transform_11(%arg0: i32) -> (i32, i32) {
    %c0_i32 = arith.constant 0 : i32
    %c0_i32_0 = arith.constant 0 : i32
    return %arg0, %c0_i32 : i32, i32
  }
  func.func @transform_12(%arg0: i32) -> (i32, i32) {
    %c0_i32 = arith.constant 0 : i32
    %c0_i32_0 = arith.constant 0 : i32
    return %arg0, %c0_i32 : i32, i32
  }
  func.func @transform_13(%arg0: i32) -> (i32, i32) {
    %c0_i32 = arith.constant 0 : i32
    %c0_i32_0 = arith.constant 0 : i32
    return %arg0, %c0_i32 : i32, i32
  }
  func.func @transform_14(%arg0: i32) -> (i32, i32) {
    %c0_i32 = arith.constant 0 : i32
    %c0_i32_0 = arith.constant 0 : i32
    return %arg0, %c0_i32 : i32, i32
  }
  func.func @transform_15(%arg0: i32) -> (i32, i32) {
    %c0_i32 = arith.constant 0 : i32
    %c0_i32_0 = arith.constant 0 : i32
    return %arg0, %c0_i32 : i32, i32
  }
  func.func @transform_16(%arg0: i32) -> (i32, i32) {
    %c0_i32 = arith.constant 0 : i32
    %c0_i32_0 = arith.constant 0 : i32
    return %arg0, %c0_i32 : i32, i32
  }
  func.func @transform_17(%arg0: i32) -> (i32, i32) {
    %c0_i32 = arith.constant 0 : i32
    %c0_i32_0 = arith.constant 0 : i32
    return %arg0, %c0_i32 : i32, i32
  }
  func.func @transform_18(%arg0: i32) -> (i32, i32) {
    %c0_i32 = arith.constant 0 : i32
    %c0_i32_0 = arith.constant 0 : i32
    return %arg0, %c0_i32 : i32, i32
  }
  func.func @transform_19(%arg0: i32) -> (i32, i32) {
    %c0_i32 = arith.constant 0 : i32
    %c0_i32_0 = arith.constant 0 : i32
    return %arg0, %c0_i32 : i32, i32
  }
  func.func @transform_20(%arg0: i32) -> (i32, i32) {
    %c0_i32 = arith.constant 0 : i32
    %c0_i32_0 = arith.constant 0 : i32
    return %arg0, %c0_i32 : i32, i32
  }
  func.func @transform_21(%arg0: i32) -> (i32, i32) {
    %c0_i32 = arith.constant 0 : i32
    %c0_i32_0 = arith.constant 0 : i32
    return %arg0, %c0_i32 : i32, i32
  }
  func.func @transform_22(%arg0: i32) -> (i32, i32) {
    %c0_i32 = arith.constant 0 : i32
    %c0_i32_0 = arith.constant 0 : i32
    return %arg0, %c0_i32 : i32, i32
  }
  func.func @transform_23(%arg0: i32) -> (i32, i32) {
    %c0_i32 = arith.constant 0 : i32
    %c0_i32_0 = arith.constant 0 : i32
    return %arg0, %c0_i32 : i32, i32
  }
  func.func @transform_24(%arg0: i32) -> (i32, i32) {
    %c0_i32 = arith.constant 0 : i32
    %c0_i32_0 = arith.constant 0 : i32
    return %arg0, %c0_i32 : i32, i32
  }
  func.func @transform_25(%arg0: i32) -> (i32, i32) {
    %c0_i32 = arith.constant 0 : i32
    %c0_i32_0 = arith.constant 0 : i32
    return %arg0, %c0_i32 : i32, i32
  }
  func.func @transform_26(%arg0: i32) -> (i32, i32) {
    %c0_i32 = arith.constant 0 : i32
    %c0_i32_0 = arith.constant 0 : i32
    return %arg0, %c0_i32 : i32, i32
  }
  func.func @transform_27(%arg0: i32) -> (i32, i32) {
    %c0_i32 = arith.constant 0 : i32
    %c0_i32_0 = arith.constant 0 : i32
    return %arg0, %c0_i32 : i32, i32
  }
  func.func @transform_28(%arg0: i32) -> (i32, i32) {
    %c0_i32 = arith.constant 0 : i32
    %c0_i32_0 = arith.constant 0 : i32
    %c0_i32_1 = arith.constant 0 : i32
    return %c0_i32, %c0_i32_0 : i32, i32
  }
  func.func @transform_29(%arg0: i32) -> (i32, i32) {
    %c0_i32 = arith.constant 0 : i32
    %c0_i32_0 = arith.constant 0 : i32
    %c0_i32_1 = arith.constant 0 : i32
    return %c0_i32, %c0_i32_0 : i32, i32
  }
  func.func @transform_30(%arg0: i32) -> (i32, i32) {
    %c0_i32 = arith.constant 0 : i32
    %c0_i32_0 = arith.constant 0 : i32
    return %arg0, %c0_i32 : i32, i32
  }
}

</mosaic_0001>

<bundles_post_ra>
// kernel: tpu_custom_call.1
= control target key start
LH: loop header
LB: loop body
LE: loop exit
PB: predicated region body
PF: predicated region fallthrough
CT: control target
= control target key end

     0   :  { %s796_s6 = smov 1   ;;  %s797_s10 = smov 2   ;;  %s1162_s0 = inlined_call_operand.smem [shape: u32[31], index: -1, kind: input, shape index: {}] }
   0x1   :  { %s835_s5 = sld [smem:[%s1162_s0]]   ;;  %s798_s14 = smov 3  }
   0x2   :  { %s840_s9 = sld [smem:[%s1162_s0 + %s796_s6]]   ;;  %s799_s18 = smov 4  }
   0x3   :  { %s845_s13 = sld [smem:[%s1162_s0 + %s797_s10]]   ;;  %s800_s22 = smov 5  }
   0x4   :  { %s850_s17 = sld [smem:[%s1162_s0 + %s798_s14]]   ;;  %s801_s26 = smov 6  }
   0x5   :  { %s855_s21 = sld [smem:[%s1162_s0 + %s799_s18]]   ;;  %s802_s30 = smov 7  }
   0x6   :  { %s860_s25 = sld [smem:[%s1162_s0 + %s800_s22]]   ;;  %s803_s4 = smov 8  }
   0x7   :  { %1166 = sst [smem:[#allocation7_spill]] %s835_s5  ;;  %s804_s10 = smov 9  }
   0x8   :  { %1167 = sst [smem:[#allocation8_spill]] %s840_s9  ;;  %s805_s15 = smov 10  }
   0x9   :  { %1168 = sst [smem:[#allocation9_spill]] %s845_s13  ;;  %s806_s20 = smov 11  }
   0xa   :  { %1169 = sst [smem:[#allocation10_spill]] %s850_s17  ;;  %s808_s1 = smov 13  }
   0xb   :  { %1170 = sst [smem:[#allocation11_spill]] %s855_s21  ;;  %s809_s7 = smov 14  }
   0xc   :  { %1171 = sst [smem:[#allocation12_spill]] %s860_s25  ;;  %s811_s22 = smov 16  }
   0xd   :  { %s865_s29 = sld [smem:[%s1162_s0 + %s801_s26]]   ;;  %s807_s26 = smov 12  }
   0xe   :  { %s870_s3 = sld [smem:[%s1162_s0 + %s802_s30]]   ;;  %s812_s28 = smov 17  }
   0xf   :  { %s875_s8 = sld [smem:[%s1162_s0 + %s803_s4]]  }
  0x10   :  { %s880_s14 = sld [smem:[%s1162_s0 + %s804_s10]]  }
  0x11   :  { %s885_s19 = sld [smem:[%s1162_s0 + %s805_s15]]   ;;  %s810_s15 = smov 15  }
  0x12   :  { %s890_s24 = sld [smem:[%s1162_s0 + %s806_s20]]  }
  0x13   :  { %1172 = sst [smem:[#allocation13_spill]] %s865_s29 }
  0x14   :  { %1173 = sst [smem:[#allocation14_spill]] %s870_s3 }
  0x15   :  { %1174 = sst [smem:[#allocation15_spill]] %s875_s8 }
  0x16   :  { %1175 = sst [smem:[#allocation16_spill]] %s880_s14 }
  0x17   :  { %s895_s30 = sld [smem:[%s1162_s0 + %s807_s26]]  }
  0x18   :  { %s900_s6 = sld [smem:[%s1162_s0 + %s808_s1]]  }
  0x19   :  { %s905_s12 = sld [smem:[%s1162_s0 + %s809_s7]]   ;;  %s813_s7 = smov 18  }
  0x1a   :  { %s910_s20 = sld [smem:[%s1162_s0 + %s810_s15]]   ;;  %s814_s15 = smov 19  }
  0x1b   :  { %s915_s27 = sld [smem:[%s1162_s0 + %s811_s22]]   ;;  %s815_s22 = smov 20  }
  0x1c   :  { %s920_s4 = sld [smem:[%s1162_s0 + %s812_s28]]   ;;  %s816_s28 = smov 21  }
  0x1d   :  { %s925_s14 = sld [smem:[%s1162_s0 + %s813_s7]]   ;;  %s817_s7 = smov 22  }
  0x1e   :  { %s930_s9 = sld [smem:[%s1162_s0 + %s814_s15]]   ;;  %s818_s15 = smov 23  }
  0x1f   :  { %s935_s29 = sld [smem:[%s1162_s0 + %s815_s22]]   ;;  %s819_s22 = smov 24  }
  0x20   :  { %s940_s13 = sld [smem:[%s1162_s0 + %s816_s28]]   ;;  %s820_s28 = smov 25  }
  0x21   :  { %s945_s5 = sld [smem:[%s1162_s0 + %s817_s7]]   ;;  %s821_s7 = smov 26  }
  0x22   :  { %s950_s25 = sld [smem:[%s1162_s0 + %s818_s15]]   ;;  %s822_s15 = smov 27  }
  0x23   :  { %s955_s8 = sld [smem:[%s1162_s0 + %s819_s22]]   ;;  %s823_s22 = smov 28  }
  0x24   :  { %s960_s21 = sld [smem:[%s1162_s0 + %s820_s28]]   ;;  %s824_s28 = smov 29  }
  0x25   :  { %s965_s3 = sld [smem:[%s1162_s0 + %s821_s7]]   ;;  %s825_s7 = smov 30  }
  0x26   :  { %s970_s17 = sld [smem:[%s1162_s0 + %s822_s15]]  }
  0x29   :  { %1176 = sst [smem:[#allocation17_spill]] %s955_s8 }
  0x2a   :  { %1177 = sst [smem:[#allocation18_spill]] %s960_s21 }
  0x2b   :  { %1178 = sst [smem:[#allocation19_spill]] %s965_s3 }
  0x2c   :  { %s975_s8 = sld [smem:[%s1162_s0 + %s823_s22]]  }
  0x2d   :  { %s980_s21 = sld [smem:[%s1162_s0 + %s824_s28]]  }
  0x2e   :  { %s985_s3 = sld [smem:[%s1162_s0 + %s825_s7]]  }
  0x2f   :  { %v186_v0 = vld [vmem:[%s885_s19] sm:$0xff]  ;;  %v335_v4 = vld [vmem:[%s930_s9 + $0x8] sm:$0xff]  ;;  %vm142_vm0 = vcmask 261120   ;;  %vm157_vm1 = vcmask 130048   ;;  %s1179_s0 = sld [smem:[#allocation17_spill]]  ;;  %s1180_s15 = sld [smem:[#allocation19_spill]] }
  0x30   :  { %v190_v1 = vld [vmem:[%s890_s24] sm:$0xff]  ;;  %v339_v5 = vld [vmem:[%s935_s29 + $0x8] sm:$0xff]  ;;  %s1181_s16 = sld [smem:[#allocation18_spill]]  ;;  %s1183_s22 = sld [smem:[#allocation14_spill]] }
  0x31   :  { %v194_v2 = vld [vmem:[%s895_s30] sm:$0xff]  ;;  %v343_v6 = vld [vmem:[%s940_s13 + $0x8] sm:$0xff]  ;;  %s1182_s18 = sld [smem:[#allocation10_spill]]  ;;  %s1184_s23 = sld [smem:[#allocation11_spill]] }
  0x32   :  { %v222_v3 = vmul.f32 %v194_v2, %v186_v0  ;;  %v371_v7 = vmul.f32 %v343_v6, %v335_v4  ;;  %v187_v8 = vld [vmem:[%s885_s19 + $0x8] sm:$0xff]  ;;  %v198_v13 = vld [vmem:[%s900_s6] sm:$0xff]  ;;  %s1185_s26 = sld [smem:[#allocation15_spill]]  ;;  %s1186_s28 = sld [smem:[#allocation12_spill]] }
  0x33   :  { %v191_v9 = vld [vmem:[%s890_s24 + $0x8] sm:$0xff]  ;;  %v202_v14 = vld [vmem:[%s905_s12] sm:$0xff]  ;;  %s1187_s1 = sld [smem:[#allocation7_spill]]  ;;  %s1188_s2 = sld [smem:[#allocation9_spill]] }
  0x34   :  { %v195_v10 = vld [vmem:[%s895_s30 + $0x8] sm:$0xff]  ;;  %v226_v11 = vmul.f32 %v222_v3, %v190_v1  ;;  %v206_v15 = vld [vmem:[%s910_s20] sm:$0xff]  ;;  %v375_v16 = vmul.f32 %v371_v7, %v339_v5  ;;  %s1189_s7 = sld [smem:[#allocation13_spill]]  ;;  %s1190_s10 = sld [smem:[#allocation8_spill]] }
  0x35   :  { %v223_v12 = vmul.f32 %v195_v10, %v187_v8  ;;  %v210_v17 = vld [vmem:[%s915_s27] sm:$0xff]  ;;  %v199_v31 = vld [vmem:[%s900_s6 + $0x8] sm:$0xff] }
  0x36   :  { %v214_v18 = vld [vmem:[%s920_s4] sm:$0xff]  ;;  %v230_v20 = vsel %vm142_vm0, %v226_v11, 0.0  ;;  %v381_v27 = vsel %vm142_vm0, %v375_v16, 0.0  ;;  %v203_v32 = vld [vmem:[%s905_s12 + $0x8] sm:$0xff] }
  0x37   :  { %v218_v19 = vld [vmem:[%s925_s14] sm:$0xff]  ;;  %v227_v21 = vmul.f32 %v223_v12, %v191_v9  ;;  %v242_v22 = vmul.f32 %v214_v18, %v198_v13  ;;  %231 = vadd.xlane.f32.xlu0 %v230_v20  ;;  %v274_v29 = vmul.f32 %v214_v18, %v202_v14  ;;  %382 = vadd.xlane.f32.xlu1 %v381_v27  ;;  %v207_v36 = vld [vmem:[%s910_s20 + $0x8] sm:$0xff]  ;;  %v200_v12 = vld [vmem:[%s900_s6 + $0x10] sm:$0xff] }
  0x38   :  { %v250_v23 = vmul.f32 %v218_v19, %v202_v14  ;;  %v334_v24 = vld [vmem:[%s930_s9] sm:$0xff]  ;;  %v262_v28 = vmul.f32 %v218_v19, %v198_v13  ;;  %v215_v37 = vld [vmem:[%s920_s4 + $0x8] sm:$0xff]  ;;  %v216_v13 = vld [vmem:[%s920_s4 + $0x10] sm:$0xff] }
  0x39   :  { %v338_v25 = vld [vmem:[%s935_s29] sm:$0xff]  ;;  %v233_v33 = vsel %vm142_vm0, %v227_v21, 0.0  ;;  %v246_v34 = vmul.f32 %v242_v22, %v206_v15  ;;  %v219_v38 = vld [vmem:[%s925_s14 + $0x8] sm:$0xff]  ;;  %v278_v40 = vmul.f32 %v274_v29, %v210_v17  ;;  %v243_v43 = vmul.f32 %v215_v37, %v199_v31  ;;  %v204_v18 = vld [vmem:[%s905_s12 + $0x10] sm:$0xff] }
  0x3a   :  { %v342_v26 = vld [vmem:[%s940_s13] sm:$0xff]  ;;  %v254_v35 = vmul.f32 %v250_v23, %v206_v15  ;;  %v266_v39 = vmul.f32 %v262_v28, %v210_v17  ;;  %v211_v42 = vld [vmem:[%s915_s27 + $0x8] sm:$0xff]  ;;  %v251_v47 = vmul.f32 %v219_v38, %v203_v32  ;;  %v263_v48 = vmul.f32 %v219_v38, %v199_v31  ;;  %v220_v19 = vld [vmem:[%s925_s14 + $0x10] sm:$0xff] }
  0x3b   :  { %v370_v30 = vmul.f32 %v342_v26, %v334_v24  ;;  %v346_v44 = vld [vmem:[%s945_s5] sm:$0xff]  ;;  %v275_v49 = vmul.f32 %v215_v37, %v203_v32  ;;  %234 = vadd.xlane.f32.xlu0 %v233_v33  ;;  %v247_v54 = vmul.f32 %v243_v43, %v207_v36  ;;  %v347_v57 = vld [vmem:[%s945_s5 + $0x8] sm:$0xff]  ;;  %v208_v24 = vld [vmem:[%s910_s20 + $0x10] sm:$0xff]  ;;  %v244_v29 = vmul.f32 %v216_v13, %v200_v12 }
  0x3c   :  { %v350_v45 = vld [vmem:[%s950_s25] sm:$0xff]  ;;  %v258_v46 = vadd.f32 %v254_v35, %v246_v34  ;;  %v351_v58 = vld [vmem:[%s950_s25 + $0x8] sm:$0xff]  ;;  %v255_v60 = vmul.f32 %v251_v47, %v207_v36  ;;  %v267_v61 = vmul.f32 %v263_v48, %v211_v42  ;;  %v212_v28 = vld [vmem:[%s915_s27 + $0x10] sm:$0xff]  ;;  %v252_v33 = vmul.f32 %v220_v19, %v204_v18 }
  0x3d   :  { %v374_v41 = vmul.f32 %v370_v30, %v338_v25  ;;  %v354_v50 = vld [vmem:[%s1179_s0] sm:$0xff]  ;;  %v279_v62 = vmul.f32 %v275_v49, %v211_v42  ;;  %v363_v0 = vld [vmem:[%s1180_s15 + $0x8] sm:$0xff]  ;;  %v188_v30 = vld [vmem:[%s885_s19 + $0x10] sm:$0xff]  ;;  %v264_v34 = vmul.f32 %v220_v19, %v200_v12 }
  0x3e   :  { %v362_v51 = vld [vmem:[%s1180_s15] sm:$0xff]  ;;  %v270_v59 = vadd.f32 %v266_v39, %v258_v46  ;;  %v367_v1 = vld [vmem:[%s970_s17 + $0x8] sm:$0xff]  ;;  %v259_v8 = vadd.f32 %v255_v60, %v247_v54  ;;  %v391_v10 = vmul.f32 %v363_v0, %v347_v57  ;;  %v423_v27 = vmul.f32 %v363_v0, %v351_v58  ;;  %v196_v35 = vld [vmem:[%s895_s30 + $0x10] sm:$0xff] }
  0x3f   :  { %v366_v52 = vld [vmem:[%s970_s17] sm:$0xff]  ;;  %v378_v53 = vsel %vm142_vm0, %v374_v41, 0.0  ;;  %v390_v55 = vmul.f32 %v362_v51, %v346_v44  ;;  %v422_v5 = vmul.f32 %v362_v51, %v350_v45  ;;  %v355_v6 = vld [vmem:[%s1179_s0 + $0x8] sm:$0xff]  ;;  %v399_v11 = vmul.f32 %v367_v1, %v351_v58  ;;  %v348_v36 = vld [vmem:[%s945_s5 + $0x10] sm:$0xff] }
  0x40   :  { %v398_v56 = vmul.f32 %v366_v52, %v350_v45  ;;  %v358_v63 = vld [vmem:[%s1181_s16] sm:$0xff]  ;;  %v410_v4 = vmul.f32 %v366_v52, %v346_v44  ;;  %v282_v7 = vsub.f32 %v270_v59, %v278_v40  ;;  %v359_v9 = vld [vmem:[%s1181_s16 + $0x8] sm:$0xff]  ;;  %379 = vadd.xlane.f32.xlu0 %v378_v53  ;;  %v411_v17 = vmul.f32 %v367_v1, %v347_v57  ;;  %v364_v37 = vld [vmem:[%s1180_s15 + $0x10] sm:$0xff] }
  0x41   :  { %v394_v2 = vmul.f32 %v390_v55, %v354_v50  ;;  %v426_v16 = vmul.f32 %v422_v5, %v358_v63  ;;  %v271_v21 = vadd.f32 %v267_v61, %v259_v8  ;;  %v395_v22 = vmul.f32 %v391_v10, %v355_v6  ;;  %v192_v42 = vld [vmem:[%s890_s24 + $0x10] sm:$0xff]  ;;  %v1058_v5 = vld [vmem:[%s1185_s26] sm:$0xff]  ;;  %v201_v19 = vld [vmem:[%s900_s6 + $0x18] sm:$0xff] }
  0x42   :  { %v402_v3 = vmul.f32 %v398_v56, %v354_v50  ;;  %v414_v15 = vmul.f32 %v410_v4, %v358_v63  ;;  %v286_v20 = vsel %vm157_vm1, %v282_v7, 0.0  ;;  %v403_v23 = vmul.f32 %v399_v11, %v355_v6  ;;  %v352_v43 = vld [vmem:[%s950_s25 + $0x10] sm:$0xff]  ;;  %v1052_v63 = vld [vmem:[%s1183_s22] sm:$0xff] }
  0x43   :  { %287 = vadd.xlane.f32.xlu1 %v286_v20  ;;  %v415_v26 = vmul.f32 %v411_v17, %v359_v9  ;;  %v283_v31 = vsub.f32 %v271_v21, %v279_v62  ;;  %v427_v39 = vmul.f32 %v423_v27, %v359_v9  ;;  %v248_v40 = vmul.f32 %v244_v29, %v208_v24  ;;  %v368_v44 = vld [vmem:[%s970_s17 + $0x10] sm:$0xff]  ;;  %v1049_v62 = vld [vmem:[%s1182_s18] sm:$0xff] }
  0x44   :  { %v406_v14 = vadd.f32 %v402_v3, %v394_v2  ;;  %v407_v32 = vadd.f32 %v403_v23, %v395_v22  ;;  %v276_v41 = vmul.f32 %v216_v13, %v204_v18  ;;  %v256_v47 = vmul.f32 %v252_v33, %v208_v24  ;;  %v356_v49 = vld [vmem:[%s1179_s0 + $0x10] sm:$0xff]  ;;  %v1055_v4 = vld [vmem:[%s1184_s23] sm:$0xff]  ;;  %v205_v24 = vld [vmem:[%s905_s12 + $0x18] sm:$0xff] }
  0x45   :  { %v289_v45 = vsel %vm157_vm1, %v283_v31, 0.0  ;;  %v268_v48 = vmul.f32 %v264_v34, %v212_v28  ;;  %v336_v50 = vld [vmem:[%s930_s9 + $0x10] sm:$0xff]  ;;  %v224_v54 = vmul.f32 %v196_v35, %v188_v30  ;;  %v392_v56 = vmul.f32 %v364_v37, %v348_v36  ;;  %v1062_v10 = vld [vmem:[%s1186_s28] sm:$0xff]  ;;  %v209_v31 = vld [vmem:[%s910_s20 + $0x18] sm:$0xff] }
  0x46   :  { %v418_v25 = vadd.f32 %v414_v15, %v406_v14  ;;  %v419_v46 = vadd.f32 %v415_v26, %v407_v32  ;;  %v344_v51 = vld [vmem:[%s940_s13 + $0x10] sm:$0xff]  ;;  %v280_v53 = vmul.f32 %v276_v41, %v212_v28  ;;  %v260_v58 = vadd.f32 %v256_v47, %v248_v40  ;;  %v1065_v11 = vld [vmem:[%s1187_s1] sm:$0xff]  ;;  %v221_v26 = vld [vmem:[%s925_s14 + $0x18] sm:$0xff] }
  0x47   :  { %290 = vadd.xlane.f32.xlu1 %v289_v45  ;;  %v360_v55 = vld [vmem:[%s1181_s16 + $0x10] sm:$0xff]  ;;  %v400_v59 = vmul.f32 %v368_v44, %v352_v43  ;;  %v412_v60 = vmul.f32 %v368_v44, %v348_v36  ;;  %v228_v0 = vmul.f32 %v224_v54, %v192_v42  ;;  %v396_v1 = vmul.f32 %v392_v56, %v356_v49  ;;  %v1068_v12 = vld [vmem:[%s1188_s2] sm:$0xff]  ;;  %v189_v36 = vld [vmem:[%s885_s19 + $0x18] sm:$0xff] }
  0x48   :  { %v430_v38 = vsub.f32 %v418_v25, %v426_v16  ;;  %v431_v57 = vsub.f32 %v419_v46, %v427_v39  ;;  %v340_v61 = vld [vmem:[%s935_s29 + $0x10] sm:$0xff]  ;;  %v424_v2 = vmul.f32 %v364_v37, %v352_v43  ;;  %v372_v3 = vmul.f32 %v344_v51, %v336_v50  ;;  %v1072_v16 = vld [vmem:[%s1189_s7] sm:$0xff]  ;;  %v217_v25 = vld [vmem:[%s920_s4 + $0x18] sm:$0xff] }
  0x49   :  { %v272_v7 = vadd.f32 %v268_v48, %v260_v58  ;;  %v404_v8 = vmul.f32 %v400_v59, %v356_v49  ;;  %v416_v9 = vmul.f32 %v412_v60, %v360_v55  ;;  %v236_v13 = vsel %vm142_vm0, %v228_v0, 0.0  ;;  %v1077_v18 = vld [vmem:[%s1190_s10] sm:$0xff]  ;;  %v197_v37 = vld [vmem:[%s895_s30 + $0x18] sm:$0xff] }
  0x4a   :  { %v434_v52 = vsel %vm157_vm1, %v430_v38, 0.0  ;;  %v437_v6 = vsel %vm157_vm1, %v431_v57, 0.0  ;;  %v428_v14 = vmul.f32 %v424_v2, %v360_v55  ;;  %v376_v15 = vmul.f32 %v372_v3, %v340_v61 }
  0x4b   :  { %435 = vadd.xlane.f32.xlu0 %v434_v52  ;;  %438 = vadd.xlane.f32.xlu1 %v437_v6  ;;  %v146_v17 = vmul.f32 %v1052_v63, %v1049_v62  ;;  %v284_v20 = vsub.f32 %v272_v7, %v280_v53  ;;  %v408_v21 = vadd.f32 %v404_v8, %v396_v1 }
  0x4c   :  { %v148_v22 = vmul.f32 %v1058_v5, %v1055_v4  ;;  %v151_v23 = vmul.f32 %v1058_v5, %v1049_v62  ;;  %v384_v27 = vsel %vm142_vm0, %v376_v15, 0.0  ;;  %v154_v29 = vmul.f32 %v1052_v63, %v1055_v4 }
  0x4d   :  { %v147_v28 = vmul.f32 %v146_v17, %v1062_v10  ;;  %v140_v30 = vmul.f32 %v1068_v12, %v1065_v11  ;;  %v292_v32 = vsel %vm157_vm1, %v284_v20, 0.0  ;;  %v420_v33 = vadd.f32 %v416_v9, %v408_v21 }
  0x4e   :  { %v149_v34 = vmul.f32 %v148_v22, %v1062_v10  ;;  %v152_v35 = vmul.f32 %v151_v23, %v1072_v16 }
  0x4f   :  { %237 = vadd.xlane.f32.xlu0 %v236_v13 }
  0x50   :  { %68 = vsyncpa [#allocation5], 0  ;;  %293 = vadd.xlane.f32.xlu1 %v292_v32  ;;  %v155_v38 = vmul.f32 %v154_v29, %v1072_v16  ;;  %v141_v39 = vmul.f32 %v140_v30, %v1077_v18  ;;  %v213_v40 = vld [vmem:[%s915_s27 + $0x18] sm:$0xff]  ;;  %v245_v41 = vmul.f32 %v217_v25, %v201_v19  ;;  %v253_v42 = vmul.f32 %v221_v26, %v205_v24 }
  0x51   :  { %v193_v43 = vld [vmem:[%s890_s24 + $0x18] sm:$0xff]  ;;  %v432_v45 = vsub.f32 %v420_v33, %v428_v14  ;;  %v150_v46 = vadd.f32 %v149_v34, %v147_v28  ;;  %v265_v47 = vmul.f32 %v221_v26, %v201_v19  ;;  %v277_v48 = vmul.f32 %v217_v25, %v205_v24 }
  0x52   :  { %v349_v44 = vld [vmem:[%s945_s5 + $0x18] sm:$0xff]  ;;  %v143_v52 = vsel %vm142_vm0, %v141_v39, 0.0  ;;  %v249_v53 = vmul.f32 %v245_v41, %v209_v31  ;;  %v257_v54 = vmul.f32 %v253_v42, %v209_v31  ;;  %v225_v55 = vmul.f32 %v197_v37, %v189_v36  ;;  %s1191_s5 = sld [smem:[#allocation16_spill]] }
  0x53   :  { %385 = vadd.xlane.f32.xlu0 %v384_v27  ;;  %v353_v49 = vld [vmem:[%s950_s25 + $0x18] sm:$0xff]  ;;  %v440_v58 = vsel %vm157_vm1, %v432_v45, 0.0  ;;  %v153_v59 = vadd.f32 %v152_v35, %v150_v46  ;;  %v269_v60 = vmul.f32 %v265_v47, %v213_v40  ;;  %v281_v61 = vmul.f32 %v277_v48, %v213_v40 }
  0x54   :  { %v365_v50 = vld [vmem:[%s1180_s15 + $0x18] sm:$0xff]  ;;  %441 = vadd.xlane.f32.xlu1 %v440_v58  ;;  %v261_v1 = vadd.f32 %v257_v54, %v249_v53  ;;  %v229_v2 = vmul.f32 %v225_v55, %v193_v43  ;;  %v536_v33 = vmul.f32 %v1077_v18, %v1077_v18  ;;  %v524_v34 = vmul.f32 %v1065_v11, %v1065_v11 }
  0x55   :  { %v369_v51 = vld [vmem:[%s970_s17 + $0x18] sm:$0xff]  ;;  %v393_v6 = vmul.f32 %v365_v50, %v349_v44  ;;  %v156_v9 = vsub.f32 %v153_v59, %v155_v38  ;;  %v425_v14 = vmul.f32 %v365_v50, %v353_v49  ;;  %v162_v43 = vstv %s975_s8 }
  0x56   :  { %v337_v56 = vld [vmem:[%s930_s9 + $0x18] sm:$0xff]  ;;  %v401_v7 = vmul.f32 %v369_v51, %v353_v49  ;;  %v413_v13 = vmul.f32 %v369_v51, %v349_v44  ;;  %v273_v17 = vadd.f32 %v269_v60, %v261_v1  ;;  %v239_v19 = vsel %vm142_vm0, %v229_v2, 0.0 }
  0x57   :  { %v345_v57 = vld [vmem:[%s940_s13 + $0x18] sm:$0xff]  ;;  %144 = vadd.xlane.f32.xlu0 %v143_v52  ;;  %v158_v22 = vsel %vm157_vm1, %v156_v9, 0.0  ;;  %v537_v35 = vsel %vm142_vm0, %v536_v33, 0.0  ;;  %v525_v36 = vsel %vm142_vm0, %v524_v34, 0.0  ;;  %v164_v11 = vstv %s980_s21 }
  0x58   :  { %v357_v0 = vld [vmem:[%s1179_s0 + $0x18] sm:$0xff]  ;;  %v373_v15 = vmul.f32 %v345_v57, %v337_v56  ;;  %159 = vadd.xlane.f32.xlu1 %v158_v22  ;;  %v285_v25 = vsub.f32 %v273_v17, %v281_v61  ;;  %vm175_vm2 = vcmask 7168  }
  0x59   :  { %v361_v3 = vld [vmem:[%s1181_s16 + $0x18] sm:$0xff]  ;;  %v397_v20 = vmul.f32 %v393_v6, %v357_v0  ;;  %v405_v21 = vmul.f32 %v401_v7, %v357_v0 }
  0x5a   :  { %v341_v8 = vld [vmem:[%s935_s29 + $0x18] sm:$0xff]  ;;  %v417_v23 = vmul.f32 %v413_v13, %v361_v3  ;;  %v429_v27 = vmul.f32 %v425_v14, %v361_v3  ;;  %v295_v28 = vsel %vm157_vm1, %v285_v25, 0.0 }
  0x5b   :  { %v377_v24 = vmul.f32 %v373_v15, %v341_v8  ;;  %v409_v26 = vadd.f32 %v405_v21, %v397_v20  ;;  %240 = vadd.xlane.f32.xlu0 %v239_v19 }
  0x5c   :  { %296 = vadd.xlane.f32.xlu1 %v295_v28 }
  0x5d   :  { %v421_v29 = vadd.f32 %v417_v23, %v409_v26  ;;  %v387_v30 = vsel %vm142_vm0, %v377_v24, 0.0 }
  0x5f   :  { %v433_v31 = vsub.f32 %v421_v29, %v429_v27  ;;  %388 = vadd.xlane.f32.xlu0 %v387_v30 }
  0x61   :  { %v443_v32 = vsel %vm157_vm1, %v433_v31, 0.0 }
  0x62   :  { %444 = vadd.xlane.f32.xlu1 %v443_v32 }
  0x63   :  { %538 = vadd.xlane.f32.xlu0 %v537_v35 }
  0x66   :  { %526 = vadd.xlane.f32.xlu1 %v525_v36 }
  0xc4   :  { %v232_v37 = vpop.xlane.xlu0 %231  ;;  %v383_v38 = vpop.xlane.xlu1 %382 }
  0xc8   :  { %v235_v39 = vpop.xlane.xlu0 %234 }
  0xcd   :  { %v380_v40 = vpop.xlane.xlu0 %379 }
  0xd0   :  { %v288_v41 = vpop.xlane.xlu1 %287 }
  0xd1   :  { %v298_v42 = vadd.f32 %v288_v41, %v232_v37 }
  0xd3   :  { %v302_v46 = vmul.f32 %v298_v42, %v162_v43 }
  0xd4   :  { %v291_v44 = vpop.xlane.xlu1 %290 }
  0xd5   :  { %v299_v45 = vadd.f32 %v291_v44, %v235_v39  ;;  %v306_v52 = vadd.f32 %v302_v46, %v164_v11 }
  0xd7   :  { %v303_v48 = vmul.f32 %v299_v45, %v162_v43  ;;  %v685_v59 = vmul.f32 -1.442695, %v306_v52 }
  0xd8   :  { %v436_v18 = vpop.xlane.xlu0 %435  ;;  %v439_v49 = vpop.xlane.xlu1 %438 }
  0xd9   :  { %v446_v47 = vadd.f32 %v436_v18, %v380_v40  ;;  %v447_v50 = vadd.f32 %v439_v49, %v383_v38  ;;  %v307_v54 = vadd.f32 %v303_v48, %v164_v11  ;;  %748 = vpow2.f32 %v685_v59 }
  0xdb   :  { %v450_v53 = vmul.f32 %v446_v47, %v162_v43  ;;  %v451_v55 = vmul.f32 %v447_v50, %v162_v43  ;;  %v686_v61 = vmul.f32 -1.442695, %v307_v54 }
  0xdc   :  { %v238_v51 = vpop.xlane.xlu0 %237 }
  0xdd   :  { %v294_v56 = vpop.xlane.xlu1 %293  ;;  %v454_v60 = vadd.f32 %v450_v53, %v164_v11  ;;  %v455_v0 = vadd.f32 %v451_v55, %v164_v11  ;;  %750 = vpow2.f32 %v686_v61 }
  0xde   :  { %v300_v57 = vadd.f32 %v294_v56, %v238_v51 }
  0xdf   :  { %v689_v8 = vmul.f32 -1.442695, %v454_v60  ;;  %v690_v9 = vmul.f32 -1.442695, %v455_v0 }
  0xe0   :  { %v386_v58 = vpop.xlane.xlu0 %385  ;;  %v304_v1 = vmul.f32 %v300_v57, %v162_v43 }
  0xe1   :  { %v442_v2 = vpop.xlane.xlu1 %441 }
  0xe2   :  { %v308_v3 = vadd.f32 %v304_v1, %v164_v11  ;;  %v448_v6 = vadd.f32 %v442_v2, %v386_v58  ;;  %v172_v58 = vld [vmem:[%s1191_s5] sm:$0xff]  ;;  %s784_s5 = scalar_lea.hbm %s985_s3, 16 }
  0xe3   :  { %v749_v29 = vpop.eup %748  ;;  %p785_p0 = scmp.ne.s32.totalorder %s985_s3, %s784_s5  ;;  %p788_p1 = scmp.lt.u32.totalorder %s784_s5, %s985_s3 }
  0xe4   :  { %v145_v7 = vpop.xlane.xlu0 %144  ;;  %v687_v13 = vmul.f32 -1.442695, %v308_v3  ;;  %v452_v14 = vmul.f32 %v448_v6, %v162_v43  ;;  %v322_v35 = vadd.f32 1.0, %v749_v29 }
  0xe5   :  { %v160_v15 = vpop.xlane.xlu1 %159  ;;  %p790_p2 = pnand %p788_p1, %p785_p0 }
  0xe6   :  { %752 = vpow2.f32 %v687_v13  ;;  %v456_v17 = vadd.f32 %v452_v14, %v164_v11  ;;  %v161_v19 = vadd.f32 %v160_v15, %v145_v7 }
  0xe7   :  { %754 = vpow2.f32 %v689_v8  ;;  %v751_v31 = vpop.eup %750 }
  0xe8   :  { %v241_v20 = vpop.xlane.xlu0 %240  ;;  %756 = vpow2.f32 %v690_v9  ;;  %v691_v21 = vmul.f32 -1.442695, %v456_v17  ;;  %v163_v22 = vmul.f32 %v162_v43, %v161_v19  ;;  %v323_v39 = vadd.f32 1.0, %v751_v31 }
  0xe9   :  { %v297_v23 = vpop.xlane.xlu1 %296 }
  0xea   :  { %758 = vpow2.f32 %v691_v21  ;;  %v165_v24 = vadd.f32 %v164_v11, %v163_v22  ;;  %v301_v25 = vadd.f32 %v297_v23, %v241_v20  ;;  %v548_v23 = vmul.f32 %v1068_v12, %v1068_v12 }
  0xeb   :  { %v560_v12 = vmul.f32 %v1049_v62, %v1049_v62  ;;  %v620_v62 = vmul.f32 %v1058_v5, %v1058_v5 }
  0xec   :  { %v389_v26 = vpop.xlane.xlu0 %388  ;;  %v684_v27 = vmul.f32 -1.442695, %v165_v24  ;;  %v305_v28 = vmul.f32 %v301_v25, %v162_v43  ;;  %v549_v31 = vsel %vm142_vm0, %v548_v23, 0.0 }
  0xee   :  { %760 = vpow2.f32 %v684_v27  ;;  %v309_v32 = vadd.f32 %v305_v28, %v164_v11 }
  0xef   :  { %v445_v30 = vpop.xlane.xlu1 %444 }
  0xf0   :  { %v449_v33 = vadd.f32 %v445_v30, %v389_v26  ;;  %v753_v34 = vpop.eup %752  ;;  %v688_v36 = vmul.f32 -1.442695, %v309_v32 }
  0xf1   :  { %v755_v38 = vpop.eup %754  ;;  %v324_v42 = vadd.f32 1.0, %v753_v34 }
  0xf2   :  { %v453_v37 = vmul.f32 %v449_v33, %v162_v43  ;;  %v757_v40 = vpop.eup %756  ;;  %762 = vpow2.f32 %v688_v36  ;;  %v470_v45 = vadd.f32 1.0, %v755_v38  ;;  %v572_v33 = vmul.f32 %v1055_v4, %v1055_v4 }
  0xf3   :  { %764 = vrcp.f32 %v322_v35  ;;  %v471_v46 = vadd.f32 1.0, %v757_v40  ;;  %v561_v36 = vsel %vm157_vm1, %v560_v12, 0.0  ;;  %v584_v38 = vmul.f32 %v1062_v10, %v1062_v10  ;;  %v539_v10 = vpop.xlane.xlu0 %538 }
  0xf4   :  { %v457_v41 = vadd.f32 %v453_v37, %v164_v11  ;;  %v759_v44 = vpop.eup %758  ;;  %766 = vrcp.f32 %v323_v39  ;;  %v573_v35 = vsel %vm157_vm1, %v572_v33, 0.0  ;;  %v596_v37 = vmul.f32 %v1072_v16, %v1072_v16 }
  0xf5   :  { %v472_v47 = vadd.f32 1.0, %v759_v44  ;;  %v585_v39 = vsel %vm157_vm1, %v584_v38, 0.0  ;;  %v608_v40 = vmul.f32 %v1052_v63, %v1052_v63 }
  0xf6   :  { %v692_v18 = vmul.f32 -1.442695, %v457_v41  ;;  %v597_v4 = vsel %vm157_vm1, %v596_v37, 0.0  ;;  %v621_v41 = vsel %vm157_vm1, %v620_v62, 0.0 }
  0xf7   :  { %v609_v16 = vsel %vm157_vm1, %v608_v40, 0.0 }
  0xf8   :  { %768 = vpow2.f32 %v692_v18  ;;  %v761_v48 = vpop.eup %760 }
  0xf9   :  { %770 = vrcp.f32 %v324_v42  ;;  %v169_v43 = vadd.f32 1.0, %v761_v48  ;;  %v527_v42 = vpop.xlane.xlu1 %526 }
  0xfa   :  { %772 = vrcp.f32 %v470_v45  ;;  %v528_v44 = vrot.slane %v527_v42, 4 }
  0xfb   :  { %774 = vrcp.f32 %v471_v46  ;;  %v540_v46 = vrot.slane %v539_v10, 4 }
  0xfc   :  { %776 = vrcp.f32 %v472_v47  ;;  %v763_v49 = vpop.eup %762  ;;  %v529_v48 = vadd.f32 %v528_v44, %v527_v42 }
  0xfd   :  { %778 = vrcp.f32 %v169_v43  ;;  %v325_v50 = vadd.f32 1.0, %v763_v49  ;;  %v765_v11 = vpop.eup %764  ;;  %v541_v63 = vadd.f32 %v540_v46, %v539_v10 }
  0xfe   :  { %v767_v51 = vpop.eup %766  ;;  %v482_v59 = vmul.f32 %v765_v11, %v765_v11 }
  0xff   :  { %780 = vrcp.f32 %v325_v50  ;;  %v483_v56 = vmul.f32 %v767_v51, %v767_v51  ;;  %v530_v51 = vrot.slane %v529_v48, 2 }
 0x100   :  { %v486_v6 = vsel %vm175_vm2, %v482_v59, 0.0 }
 0x101   :  { %v487_v2 = vsel %vm175_vm2, %v483_v56, 0.0 }
 0x102   :  { %v769_v52 = vpop.eup %768  ;;  %v488_v15 = vadd.f32 %v487_v2, %v486_v6 }
 0x103   :  { %v771_v53 = vpop.eup %770  ;;  %v473_v54 = vadd.f32 1.0, %v769_v52 }
 0x104   :  { %v773_v55 = vpop.eup %772  ;;  %v484_v61 = vmul.f32 %v771_v53, %v771_v53 }
 0x105   :  { %v775_v57 = vpop.eup %774  ;;  %782 = vrcp.f32 %v473_v54  ;;  %v502_v9 = vmul.f32 %v773_v55, %v773_v55 }
 0x106   :  { %v777_v60 = vpop.eup %776  ;;  %v503_v3 = vmul.f32 %v775_v57, %v775_v57  ;;  %v489_v8 = vsel %vm175_vm2, %v484_v61, 0.0 }
 0x107   :  { %v779_v0 = vpop.eup %778  ;;  %v504_v13 = vmul.f32 %v777_v60, %v777_v60  ;;  %v490_v21 = vadd.f32 %v489_v8, %v488_v15  ;;  %v506_v24 = vsel %vm175_vm2, %v502_v9, 0.0 }
 0x108   :  { %v173_v1 = vsub.f32 %v779_v0, %v172_v58  ;;  %v507_v20 = vsel %vm175_vm2, %v503_v3, 0.0  ;;  %v542_v58 = vrot.slane %v541_v63, 2  ;;  %v531_v3 = vadd.f32 %v530_v51, %v529_v48 }
 0x109   :  { %v781_v14 = vpop.eup %780  ;;  %v509_v25 = vsel %vm175_vm2, %v504_v13, 0.0  ;;  %v508_v28 = vadd.f32 %v507_v20, %v506_v24 }
 0x10a   :  { %v174_v7 = vmul.f32 %v173_v1, %v173_v1  ;;  %v485_v19 = vmul.f32 %v781_v14, %v781_v14  ;;  %v543_v14 = vadd.f32 %v542_v58, %v541_v63  ;;  %v532_v24 = vrot.slane %v531_v3, 1 }
 0x10b   :  { %v510_v30 = vadd.f32 %v509_v25, %v508_v28 }
 0x10c   :  { %v176_v17 = vsel %vm175_vm2, %v174_v7, 0.0  ;;  %v491_v22 = vsel %vm175_vm2, %v485_v19, 0.0  ;;  %v533_v38 = vadd.f32 %v532_v24, %v531_v3 }
 0x10d   :  { %177 = vadd.xlane.f32.xlu0 %v176_v17  ;;  %v492_v27 = vadd.f32 %v491_v22, %v490_v21 }
 0x10f   :  { %v783_v26 = vpop.eup %782  ;;  %493 = vadd.xlane.f32.xlu1 %v492_v27 }
 0x110   :  { %v505_v29 = vmul.f32 %v783_v26, %v783_v26 }
 0x112   :  { %v511_v32 = vsel %vm175_vm2, %v505_v29, 0.0 }
 0x113   :  { %v512_v34 = vadd.f32 %v511_v32, %v510_v30  ;;  %550 = vadd.xlane.f32.xlu1 %v549_v31  ;;  %v544_v30 = vrot.slane %v543_v14, 1 }
 0x115   :  { %513 = vadd.xlane.f32.xlu0 %v512_v34 }
 0x117   :  { %574 = vadd.xlane.f32.xlu1 %v573_v35 }
 0x119   :  { %562 = vadd.xlane.f32.xlu0 %v561_v36 }
 0x11b   :  { %598 = vadd.xlane.f32.xlu1 %v597_v4 }
 0x11d   :  { %586 = vadd.xlane.f32.xlu0 %v585_v39 }
 0x11f   :  { %622 = vadd.xlane.f32.xlu1 %v621_v41 }
 0x121   :  { %610 = vadd.xlane.f32.xlu0 %v609_v16  ;;  %v545_v16 = vadd.f32 %v544_v30, %v543_v14 }
 0x19a   :  { %v178_v45 = vpop.xlane.xlu0 %177 }
 0x19b   :  { %v179_v18 = vrot.slane %v178_v45, 4 }
 0x19c   :  { %v494_v5 = vpop.xlane.xlu1 %493 }
 0x19d   :  { %v180_v47 = vadd.f32 %v179_v18, %v178_v45  ;;  %v495_v49 = vrot.slane %v494_v5, 4 }
 0x19f   :  { %v181_v43 = vrot.slane %v180_v47, 2  ;;  %v496_v50 = vadd.f32 %v495_v49, %v494_v5 }
 0x1a0   :  { %v551_v52 = vpop.xlane.xlu1 %550 }
 0x1a1   :  { %v182_v11 = vadd.f32 %v181_v43, %v180_v47  ;;  %v497_v54 = vrot.slane %v496_v50, 2  ;;  %v552_v55 = vrot.slane %v551_v52, 4 }
 0x1a2   :  { %v514_v53 = vpop.xlane.xlu0 %513 }
 0x1a3   :  { %v515_v56 = vrot.slane %v514_v53, 4  ;;  %v183_v57 = vrot.slane %v182_v11, 1  ;;  %v553_v59 = vadd.f32 %v552_v55, %v551_v52  ;;  %v498_v0 = vadd.f32 %v497_v54, %v496_v50 }
 0x1a4   :  { %v575_v1 = vpop.xlane.xlu1 %574 }
 0x1a5   :  { %v516_v60 = vadd.f32 %v515_v56, %v514_v53  ;;  %v184_v61 = vadd.f32 %v183_v57, %v182_v11  ;;  %v554_v6 = vrot.slane %v553_v59, 2  ;;  %v576_v8 = vrot.slane %v575_v1, 4 }
 0x1a6   :  { %v563_v2 = vpop.xlane.xlu0 %562  ;;  %v499_v13 = vrot.slane %v498_v0, 1 }
 0x1a7   :  { %v517_v7 = vrot.slane %v516_v60, 2  ;;  %v564_v9 = vrot.slane %v563_v2, 4  ;;  %693 = vpush %v184_v61  ;;  %v577_v15 = vadd.f32 %v576_v8, %v575_v1  ;;  %v555_v20 = vadd.f32 %v554_v6, %v553_v59 }
 0x1a8   :  { %v599_v21 = vpop.xlane.xlu1 %598  ;;  %v500_v23 = vadd.f32 %v499_v13, %v498_v0 }
 0x1a9   :  { %v565_v17 = vadd.f32 %v564_v9, %v563_v2  ;;  %v518_v19 = vadd.f32 %v517_v7, %v516_v60  ;;  %v578_v25 = vrot.slane %v577_v15, 2  ;;  %v600_v27 = vrot.slane %v599_v21, 4 }
 0x1aa   :  { %v587_v22 = vpop.xlane.xlu0 %586  ;;  %695 = vpush %v500_v23  ;;  %v556_v31 = vrot.slane %v555_v20, 1 }
 0x1ab   :  { %v566_v26 = vrot.slane %v565_v17, 2  ;;  %v588_v28 = vrot.slane %v587_v22, 4  ;;  %v519_v29 = vrot.slane %v518_v19, 1  ;;  %v601_v32 = vadd.f32 %v600_v27, %v599_v21 }
 0x1ac   :  { %v579_v34 = vadd.f32 %v578_v25, %v577_v15  ;;  %v623_v35 = vpop.xlane.xlu1 %622  ;;  %v557_v4 = vadd.f32 %v556_v31, %v555_v20 }
 0x1ad   :  { %v589_v33 = vadd.f32 %v588_v28, %v587_v22  ;;  %v567_v12 = vadd.f32 %v566_v26, %v565_v17  ;;  %v520_v37 = vadd.f32 %v519_v29, %v518_v19  ;;  %v602_v39 = vrot.slane %v601_v32, 2 }
 0x1ae   :  { %v611_v36 = vpop.xlane.xlu0 %610  ;;  %v624_v40 = vrot.slane %v623_v35, 4  ;;  %v580_v42 = vrot.slane %v579_v34, 1 }
 0x1af   :  { %v590_v62 = vrot.slane %v589_v33, 2  ;;  %v612_v41 = vrot.slane %v611_v36, 4  ;;  %697 = vpush %v520_v37  ;;  %v568_v10 = vrot.slane %v567_v12, 1  ;;  %v603_v46 = vadd.f32 %v602_v39, %v601_v32 }
 0x1b0   :  { %v625_v44 = vadd.f32 %v624_v40, %v623_v35  ;;  %699 = vpush %v533_v38  ;;  %v581_v48 = vadd.f32 %v580_v42, %v579_v34 }
 0x1b1   :  { %v613_v45 = vadd.f32 %v612_v41, %v611_v36  ;;  %v591_v18 = vadd.f32 %v590_v62, %v589_v33  ;;  %701 = vpush %v545_v16  ;;  %v569_v47 = vadd.f32 %v568_v10, %v567_v12  ;;  %v604_v63 = vrot.slane %v603_v46, 1 }
 0x1b2   :  { %v626_v5 = vrot.slane %v625_v44, 2  ;;  %703 = vpush %v557_v4 }
 0x1b3   :  { %v614_v43 = vrot.slane %v613_v45, 2  ;;  %v592_v49 = vrot.slane %v591_v18, 1  ;;  %705 = vpush %v569_v47  ;;  %v605_v52 = vadd.f32 %v604_v63, %v603_v46 }
 0x1b4   :  { %v627_v50 = vadd.f32 %v626_v5, %v625_v44  ;;  %707 = vpush %v581_v48 }
 0x1b5   :  { %v615_v11 = vadd.f32 %v614_v43, %v613_v45  ;;  %v593_v51 = vadd.f32 %v592_v49, %v591_v18 }
 0x1b6   :  { %v628_v54 = vrot.slane %v627_v50, 1 }
 0x1b7   :  { %709 = vpush %v593_v51  ;;  %v616_v53 = vrot.slane %v615_v11, 1 }
 0x1b8   :  { %711 = vpush %v605_v52  ;;  %v629_v56 = vadd.f32 %v628_v54, %v627_v50 }
 0x1b9   :  { %v617_v55 = vadd.f32 %v616_v53, %v615_v11 }
 0x1bb   :  { %713 = vpush %v617_v55 }
 0x1bc   :  { %715 = vpush %v629_v56 }
 0x1d8   :  { %s694_s9 = spop %693 }
 0x1db   :  { %s696_s13 = spop %695 }
 0x1e0   :  { %s698_s17 = spop %697 }
 0x1e1   :  { %s700_s21 = spop %699  ;;  %s522_s24 = sadd.f32 %s698_s17, %s696_s13 }
 0x1e2   :  { %s702_s25 = spop %701 }
 0x1e3   :  { %s547_s29 = sadd.f32 %s702_s25, %s700_s21  ;;  %s704_s8 = spop %703 }
 0x1e4   :  { %s706_s19 = spop %705  ;;  %s523_s27 = smul.f32 0.25, %s522_s24 }
 0x1e5   :  { %s559_s14 = sadd.f32 %s704_s8, %s547_s29  ;;  %s708_s6 = spop %707 }
 0x1e6   :  { %s632_s16 = smul.f32 0.5, %s523_s27 }
 0x1e7   :  { %s571_s30 = sadd.f32 %s706_s19, %s559_s14 }
 0x1e8   :  { %s710_s12 = spop %709  ;;  %s633_s26 = sadd.f32 %s694_s9, %s632_s16 }
 0x1e9   :  { %s583_s20 = sadd.f32 %s708_s6, %s571_s30  ;;  %s712_s11 = spop %711 }
 0x1ea   :  { %s634_s2 = smul.f32 0.125, %s633_s26 }
 0x1eb   :  { %s595_s4 = sadd.f32 %s710_s12, %s583_s20 }
 0x1ec   :  { %s714_s0 = spop %713 }
 0x1ed   :  { %s607_s15 = sadd.f32 %s712_s11, %s595_s4  ;;  %s716_s22 = spop %715 }
 0x1ef   :  { %s619_s18 = sadd.f32 %s714_s0, %s607_s15 }
 0x1f1   :  { %s631_s23 = sadd.f32 %s716_s22, %s619_s18 }
 0x1f3   :  { %s635_s28 = smul.f32 0.0005, %s631_s23 }
 0x1f5   :  { %s636_s1 = smul.f32 0.5, %s635_s28 }
 0x1f7   :  { %s637_s7 = smul.f32 0.125, %s636_s1 }
 0x1f9   :  { %s638_s10 = sadd.f32 %s637_s7, %s634_s2 }
 0x1fb   :  { %640 = sst [smem:[#allocation4]] %s638_s10 }
 0x1fc   :  { %793 = shalt.err (!%p790_p2)
}
 0x1fd   :  { %s826_s13 = smov [#allocation4]  }
 0x1fe   :  { %648 = dma.smem_to_hbm %s826_s13, 16, %s985_s3, [#allocation5]  }
 0x1ff   :  { %794 = dma.done.wait [#allocation5], 16  }
 0x200   :  { %795 = vsyncadd [#allocation5], 4294967280 }
 0x201   :  { %652 = sfence }
 0x202   :  { %653 = vsyncpa [#allocation5], 1 }

</bundles_post_ra>
